<compile_context>
chip_gen: v7x
topology: tpu7x:2x2x1
jax: 0.10.0
libtpu: 0.0.40
codegen_flags: <defaults>
</compile_context>

<pallas_src>
import math

import jax
import jax.numpy as jnp
import numpy as np
from jax.experimental import pallas as pl
from jax.experimental.pallas import tpu as pltpu


# --------------------------------------------------------------------------- #
# Generation-aware hardware configuration
# --------------------------------------------------------------------------- #

def _tpu_generation() -> str:
    try:
        kind = jax.devices()[0].device_kind.lower()
    except Exception:
        return "unknown"
    if "v7" in kind or "tpu7" in kind:
        return "v7x"
    if "v6" in kind or "tpu6" in kind:
        return "v6e"
    if "v5p" in kind:
        return "v5p"
    if "v5" in kind:          # "TPU v5 lite" / "TPU v5e"
        return "v5e"
    if "v4" in kind:
        return "v4"
    return "unknown"


_GEN_CFG = {
    #          TCs/chip      batch-tile row cap   physical VMEM fallback
    "v7x":     dict(num_cores=2, max_rows=256, vmem_phys=64 << 20),
    "v6e":     dict(num_cores=1, max_rows=256, vmem_phys=128 << 20),
    "v5e":     dict(num_cores=1, max_rows=128, vmem_phys=128 << 20),
    "v5p":     dict(num_cores=2, max_rows=128, vmem_phys=128 << 20),
    "v4":      dict(num_cores=2, max_rows=128, vmem_phys=128 << 20),
    "unknown": dict(num_cores=1, max_rows=128, vmem_phys=64 << 20),
}


def _vmem_cap_bytes(gen: str) -> int:
    """Usable per-core VMEM budget: physical capacity minus compiler headroom."""
    phys = None
    try:
        phys = int(pltpu.get_tpu_info().vmem_capacity_bytes)
    except Exception:
        phys = None
    if not phys:
        phys = _GEN_CFG[gen]["vmem_phys"]
    headroom = max(phys // 6, 10 << 20)   # ~10 MiB on v7x, ~21 MiB on v5e/v6e
    return max(phys - headroom, 16 << 20)


# --------------------------------------------------------------------------- #
# Kernel
# --------------------------------------------------------------------------- #

def _make_gaussian_score_kernel(compute_dtype):
    """Build the fused GaussianScore forward kernel.

    compute_dtype: dtype of the MXU matmul *inputs* (accumulation is always f32).
    """

    def kernel(scal_ref, x_ref, y_ref, w_ref, a_ref, at_ref, wat_ref, o_ref):
        # scal_ref (SMEM): [sigma, 1/mu, 1/var]
        sigma = scal_ref[0]
        inv_mu = scal_ref[1]
        inv_var = scal_ref[2]

        x = x_ref[...]                                                   # (TB, D) f32
        # eps = x @ W_eps                                  (MXU, f32 accumulation)
        eps = jnp.dot(x.astype(compute_dtype), w_ref[...],
                      preferred_element_type=jnp.float32)                # (TB, D)
        # denoised estimate x_ = (x - sigma * eps) / mu
        x_hat = (x - sigma * eps) * inv_mu                               # (TB, D)
        # err = y - A(x_), scaled by 1/var
        ax = jnp.dot(x_hat.astype(compute_dtype), a_ref[...],
                     preferred_element_type=jnp.float32)                 # (TB, M)
        e_iv = (y_ref[...] - ax) * inv_var                               # (TB, M)
        e_c = e_iv.astype(compute_dtype)
        # g  = (err/var) @ A^T           (= d log_p / d x_)
        # gW = (err/var) @ (W_eps@A)^T   (== g @ W_eps^T, fused: no W^T needed,
        #                                 and g / gW are independent MXU ops)
        g = jnp.dot(e_c, at_ref[...], preferred_element_type=jnp.float32)    # (TB, D)
        gw = jnp.dot(e_c, wat_ref[...], preferred_element_type=jnp.float32)  # (TB, D)
        # s = d log_p / d x = (g - sigma * gW) / mu ;  module returns eps - sigma * s
        s = (g - sigma * gw) * inv_mu
        o_ref[...] = (eps - sigma * s).astype(o_ref.dtype)

    return kernel


# --------------------------------------------------------------------------- #
# Host-side preparation and wrapper
# --------------------------------------------------------------------------- #

def prepare_weights(W_eps, A_mat, *, matmul_dtype=jnp.bfloat16):
    """One-time host-side weight preparation (do NOT redo per call).

    Builds A^T and the fused (W_eps @ A_mat)^T so the kernel never needs
    W_eps^T, and casts the matmul operands to `matmul_dtype` (bf16 by default
    for the TPU bf16 MXU; accumulation stays f32 inside the kernel).
    """
    # TODO(synk): A and A^T hold the same data twice; a trans_b contraction could
    # drop one of them if Mosaic lowers it without a per-step XLU transpose.
    W_eps = jnp.asarray(W_eps, jnp.float32)
    A_mat = jnp.asarray(A_mat, jnp.float32)
    WA = W_eps @ A_mat                       # (D, M), computed in f32 then cast
    return {
        "W": W_eps.astype(matmul_dtype),     # (D, D)
        "A": A_mat.astype(matmul_dtype),     # (D, M)
        "AT": A_mat.T.astype(matmul_dtype),  # (M, D)
        "WAT": WA.T.astype(matmul_dtype),    # (M, D)
        "dtype": matmul_dtype,
    }


def _pick_batch_tile(B, *, num_cores, max_rows, row_align):
    """Batch tile: as large as possible (<= max_rows), aligned to `row_align`.

    Only force >= `num_cores` grid steps on multi-TensorCore parts (v7x); on
    1-TC v5e/v6e a single big tile avoids per-step pipeline overhead and keeps
    the MXU fed with tall LHS tiles.
    """
    if B <= row_align:
        return B
    tb = min(max_rows, (B // row_align) * row_align)
    if (num_cores > 1 and pl.cdiv(B, tb) < num_cores
            and B >= num_cores * row_align):
        per_core = pl.cdiv(B, num_cores)
        tb = max(row_align, ((per_core + row_align - 1) // row_align) * row_align)
    return tb


def gaussian_score(x, y, weights, t, *, std, gamma, eta, tb=None):
    """Fused Pallas forward of GaussianScore: returns eps - sigma * score."""
    B, D = x.shape
    M = y.shape[1]
    wd = weights["dtype"]
    assert weights["W"].shape == (D, D) and weights["A"].shape == (D, M)

    gen = _tpu_generation()
    cfg = _GEN_CFG[gen]

    # ---- scalar noise schedule (VPSDE 'cos' alpha): pure host Python math ----
    # t / std / gamma / eta are Python scalars, so no device-side ops or
    # HBM dependency sits in front of the pallas_call.
    t = float(t)
    mu = math.cos(math.acos(math.sqrt(eta)) * t) ** 2
    sigma = math.sqrt(1.0 - mu * mu + eta * eta)
    var = std * std + gamma * (sigma / mu) ** 2
    scal = np.array([sigma, 1.0 / mu, 1.0 / var], dtype=np.float32)     # (3,)

    # ---- batch tiling: no HBM padding; Pallas masks the ragged last block ----
    # (strictly row-independent computation -> garbage rows in a partial last
    #  block cannot contaminate valid rows, and their writes are masked.)
    row_align = 16 if jnp.dtype(wd) == jnp.dtype(jnp.bfloat16) else 8
    if tb is None:
        tb = _pick_batch_tile(B, num_cores=cfg["num_cores"],
                              max_rows=cfg["max_rows"], row_align=row_align)
    grid = (pl.cdiv(B, tb),)

    # Grid-invariant weight blocks: single-buffered, resident in VMEM.
    def weight_spec(shape):
        return pl.BlockSpec(shape, lambda i: (0, 0), pipeline_mode=pl.Buffered(1))

    # ---- VMEM budget: generation-aware cap, explicit failure if oversize ----
    w_item = jnp.dtype(wd).itemsize
    weight_bytes = (D * D + 3 * D * M) * w_item
    tile_bytes = 2 * (tb * D * 4 + tb * M * 4 + tb * D * 4)   # double-buffered x/y/out
    vmem_cap = _vmem_cap_bytes(gen)
    need = weight_bytes + tile_bytes + (2 << 20)               # + compiler scratch slack
    if need > vmem_cap:
        # TODO(synk): for D this large, add a reduction grid axis over D-tiles
        # ("arbitrary", innermost) with f32 VMEM accumulators (two-sweep: finish
        # err before g/gw) instead of keeping whole DxD / DxM weights resident.
        raise ValueError(
            f"GaussianScore kernel needs ~{need / 2**20:.1f} MiB of VMEM "
            f"(resident weights {weight_bytes / 2**20:.1f} MiB + tiles) but only "
            f"{vmem_cap / 2**20:.1f} MiB is budgeted on {gen}; a K/N-tiled "
            f"variant is required for this problem size.")
    vmem_limit = min(max(int(1.25 * need) + (4 << 20), 16 << 20), vmem_cap)

    # Advisory cost estimate: 4 MXU matmuls + elementwise epilogue.
    flops = 2 * B * D * (D + 3 * M) + 8 * B * D + 2 * B * M
    bytes_accessed = weight_bytes + 2 * B * D * 4 + B * M * 4 + int(scal.nbytes)
    cost = pl.CostEstimate(flops=flops, transcendentals=0,
                           bytes_accessed=bytes_accessed)

    return pl.pallas_call(
        _make_gaussian_score_kernel(wd),
        out_shape=jax.ShapeDtypeStruct((B, D), jnp.float32),
        grid_spec=pl.GridSpec(
            grid=grid,
            in_specs=[
                pl.BlockSpec(memory_space=pltpu.MemorySpace.SMEM),   # [sigma, 1/mu, 1/var]
                pl.BlockSpec((tb, D), lambda i: (i, 0)),             # x tile
                pl.BlockSpec((tb, M), lambda i: (i, 0)),             # y tile
                weight_spec((D, D)),                                 # W_eps
                weight_spec((D, M)),                                 # A
                weight_spec((M, D)),                                 # A^T
                weight_spec((M, D)),                                 # (W_eps @ A)^T
            ],
            out_specs=pl.BlockSpec((tb, D), lambda i: (i, 0)),
        ),
        compiler_params=pltpu.CompilerParams(
            dimension_semantics=("parallel",),
            vmem_limit_bytes=vmem_limit,
        ),
        cost_estimate=cost,
    )(scal, x, y, weights["W"], weights["A"], weights["AT"], weights["WAT"])


def gaussian_score_ref(x, y, W_eps, A_mat, t, *, std, gamma, eta):
    """Plain-JAX f32 reference mirroring the PyTorch module via autodiff."""
    t = jnp.asarray(t, jnp.float32)
    mu = jnp.cos(math.acos(math.sqrt(eta)) * t) ** 2
    sigma = jnp.sqrt(1.0 - mu**2 + eta**2)

    def eps_fn(xx):
        return xx @ W_eps

    eps = eps_fn(x)

    def log_p(xx):
        e = eps_fn(xx)
        x_ = (xx - sigma * e) / mu
        err = y - x_ @ A_mat
        var = std**2 + gamma * (sigma / mu) ** 2
        return -jnp.sum(err**2 / var) / 2

    s = jax.grad(log_p)(x)
    return eps - sigma * s


if __name__ == "__main__":
    # x is an NCHW image batch flattened to (B, D); y lives in observation space (B, M).
    B, C, H, Wd = 16, 4, 8, 8
    D = C * H * Wd          # 256  (multiple of 128 -> lane-dense tiles)
    M = 128                 # observation dim (multiple of 128)
    std, gamma, eta = 0.1, 0.01, 1e-3
    t = 0.5

    key = jax.random.PRNGKey(0)
    kx, ky, kw, ka = jax.random.split(key, 4)
    x_img = jax.random.normal(kx, (B, C, H, Wd), dtype=jnp.float32)
    x = x_img.reshape(B, D)
    y = jax.random.normal(ky, (B, M), dtype=jnp.float32)
    # deterministic synthetic parameters for the linear eps-net and observation operator A
    W_eps = jax.random.normal(kw, (D, D), dtype=jnp.float32) / math.sqrt(D)
    A_mat = jax.random.normal(ka, (D, M), dtype=jnp.float32) / math.sqrt(D)

    ref = np.asarray(
        gaussian_score_ref(x, y, W_eps, A_mat, t, std=std, gamma=gamma, eta=eta))

    # f32 matmul path: strict accuracy check.
    w_f32 = prepare_weights(W_eps, A_mat, matmul_dtype=jnp.float32)
    out_f32 = jax.block_until_ready(
        gaussian_score(x, y, w_f32, t, std=std, gamma=gamma, eta=eta))
    np.testing.assert_allclose(np.asarray(out_f32), ref, rtol=2e-3, atol=5e-3)

    # Ragged batch (12 rows, forced 8-row tile): exercises the masked partial
    # last block that replaced the old HBM padding path.
    out_part = jax.block_until_ready(
        gaussian_score(x[:12], y[:12], w_f32, t, std=std, gamma=gamma, eta=eta, tb=8))
    np.testing.assert_allclose(np.asarray(out_part), ref[:12], rtol=2e-3, atol=5e-3)

    # bf16 matmul-input path (default; feeds the bf16 MXU, f32 accumulation).
    w_bf16 = prepare_weights(W_eps, A_mat, matmul_dtype=jnp.bfloat16)
    out_bf16 = jax.block_until_ready(
        gaussian_score(x, y, w_bf16, t, std=std, gamma=gamma, eta=eta))
    scale = float(np.max(np.abs(ref)))
    np.testing.assert_allclose(np.asarray(out_bf16) / scale, ref / scale, atol=3e-2)

    print("KERNEL_OK")
</pallas_src>

<mosaic_0001>
module attributes {stable_mosaic.version = 11 : i64} {
  func.func @kernel(%arg0: i32, %arg1: memref<3xf32, #tpu.memory_space<smem>>, %arg2: memref<16x256xf32, #tpu.memory_space<vmem>>, %arg3: memref<16x128xf32, #tpu.memory_space<vmem>>, %arg4: memref<256x256xf32, #tpu.memory_space<vmem>>, %arg5: memref<256x128xf32, #tpu.memory_space<vmem>>, %arg6: memref<128x256xf32, #tpu.memory_space<vmem>>, %arg7: memref<128x256xf32, #tpu.memory_space<vmem>>, %arg8: memref<16x256xf32, #tpu.memory_space<vmem>>) attributes {dimension_semantics = [#tpu.dimension_semantics<parallel>], iteration_bounds = array<i64: 1>, scalar_prefetch = 0 : i64, scratch_operands = 0 : i64, tpu.core_type = #tpu.core_type<tc>, window_params = [{transform_indices = @transform_0, window_bounds = array<i64: 3>}, {transform_indices = @transform_1, window_bounds = array<i64: 16, 256>}, {transform_indices = @transform_2, window_bounds = array<i64: 16, 128>}, {pipeline_mode = #tpu.pipeline_mode<synchronous>, transform_indices = @transform_3, window_bounds = array<i64: 256, 256>}, {pipeline_mode = #tpu.pipeline_mode<synchronous>, transform_indices = @transform_4, window_bounds = array<i64: 256, 128>}, {pipeline_mode = #tpu.pipeline_mode<synchronous>, transform_indices = @transform_5, window_bounds = array<i64: 128, 256>}, {pipeline_mode = #tpu.pipeline_mode<synchronous>, transform_indices = @transform_6, window_bounds = array<i64: 128, 256>}, {transform_indices = @transform_7, window_bounds = array<i64: 16, 256>}]} {
    %c0 = arith.constant 0 : index
    %0 = memref.load %arg1[%c0] : memref<3xf32, #tpu.memory_space<smem>>
    %c1 = arith.constant 1 : index
    %1 = memref.load %arg1[%c1] : memref<3xf32, #tpu.memory_space<smem>>
    %c2 = arith.constant 2 : index
    %2 = memref.load %arg1[%c2] : memref<3xf32, #tpu.memory_space<smem>>
    %c0_0 = arith.constant 0 : index
    %c0_1 = arith.constant 0 : index
    %3 = vector.load %arg2[%c0_0, %c0_1] : memref<16x256xf32, #tpu.memory_space<vmem>>, vector<16x256xf32>
    %c0_2 = arith.constant 0 : index
    %c0_3 = arith.constant 0 : index
    %4 = vector.load %arg4[%c0_2, %c0_3] : memref<256x256xf32, #tpu.memory_space<vmem>>, vector<256x256xf32>
    %cst = arith.constant dense<0.000000e+00> : vector<16x256xf32>
    %5 = tpu.matmul %3, %4, %cst {dimension_numbers = #tpu.dot_dimension_numbers<[1], [0], [0], [1], [0, 0, 1, 1], [], []>} : vector<16x256xf32>, vector<256x256xf32>, vector<16x256xf32> -> vector<16x256xf32>
    %6 = vector.broadcast %0 : f32 to vector<16x256xf32>
    %7 = arith.mulf %6, %5 : vector<16x256xf32>
    %8 = arith.subf %3, %7 : vector<16x256xf32>
    %9 = vector.broadcast %1 : f32 to vector<16x256xf32>
    %10 = arith.mulf %8, %9 : vector<16x256xf32>
    %c0_4 = arith.constant 0 : index
    %c0_5 = arith.constant 0 : index
    %11 = vector.load %arg5[%c0_4, %c0_5] : memref<256x128xf32, #tpu.memory_space<vmem>>, vector<256x128xf32>
    %cst_6 = arith.constant dense<0.000000e+00> : vector<16x128xf32>
    %12 = tpu.matmul %10, %11, %cst_6 {dimension_numbers = #tpu.dot_dimension_numbers<[1], [0], [0], [1], [0, 0, 1, 1], [], []>} : vector<16x256xf32>, vector<256x128xf32>, vector<16x128xf32> -> vector<16x128xf32>
    %c0_7 = arith.constant 0 : index
    %c0_8 = arith.constant 0 : index
    %13 = vector.load %arg3[%c0_7, %c0_8] : memref<16x128xf32, #tpu.memory_space<vmem>>, vector<16x128xf32>
    %14 = arith.subf %13, %12 : vector<16x128xf32>
    %15 = vector.broadcast %2 : f32 to vector<16x128xf32>
    %16 = arith.mulf %14, %15 : vector<16x128xf32>
    %c0_9 = arith.constant 0 : index
    %c0_10 = arith.constant 0 : index
    %17 = vector.load %arg6[%c0_9, %c0_10] : memref<128x256xf32, #tpu.memory_space<vmem>>, vector<128x256xf32>
    %cst_11 = arith.constant dense<0.000000e+00> : vector<16x256xf32>
    %18 = tpu.matmul %16, %17, %cst_11 {dimension_numbers = #tpu.dot_dimension_numbers<[1], [0], [0], [1], [0, 0, 1, 1], [], []>} : vector<16x128xf32>, vector<128x256xf32>, vector<16x256xf32> -> vector<16x256xf32>
    %c0_12 = arith.constant 0 : index
    %c0_13 = arith.constant 0 : index
    %19 = vector.load %arg7[%c0_12, %c0_13] : memref<128x256xf32, #tpu.memory_space<vmem>>, vector<128x256xf32>
    %cst_14 = arith.constant dense<0.000000e+00> : vector<16x256xf32>
    %20 = tpu.matmul %16, %19, %cst_14 {dimension_numbers = #tpu.dot_dimension_numbers<[1], [0], [0], [1], [0, 0, 1, 1], [], []>} : vector<16x128xf32>, vector<128x256xf32>, vector<16x256xf32> -> vector<16x256xf32>
    %21 = vector.broadcast %0 : f32 to vector<16x256xf32>
    %22 = arith.mulf %21, %20 : vector<16x256xf32>
    %23 = arith.subf %18, %22 : vector<16x256xf32>
    %24 = vector.broadcast %1 : f32 to vector<16x256xf32>
    %25 = arith.mulf %23, %24 : vector<16x256xf32>
    %26 = vector.broadcast %0 : f32 to vector<16x256xf32>
    %27 = arith.mulf %26, %25 : vector<16x256xf32>
    %28 = arith.subf %5, %27 : vector<16x256xf32>
    %c0_15 = arith.constant 0 : index
    %c0_16 = arith.constant 0 : index
    %29 = vector.load %arg8[%c0_15, %c0_16] : memref<16x256xf32, #tpu.memory_space<vmem>>, vector<16x256xf32>
    tpu.vector_store %arg8[%c0_15, %c0_16], %28 {strides = array<i32>} : memref<16x256xf32, #tpu.memory_space<vmem>>, vector<16x256xf32>,
    return
  }
  func.func @transform_0(%arg0: i32) -> i32 {
    %c0_i32 = arith.constant 0 : i32
    %c0_i32_0 = arith.constant 0 : i32
    return %c0_i32 : i32
  }
  func.func @transform_1(%arg0: i32) -> (i32, i32) {
    %c0_i32 = arith.constant 0 : i32
    %c0_i32_0 = arith.constant 0 : i32
    return %arg0, %c0_i32 : i32, i32
  }
  func.func @transform_2(%arg0: i32) -> (i32, i32) {
    %c0_i32 = arith.constant 0 : i32
    %c0_i32_0 = arith.constant 0 : i32
    return %arg0, %c0_i32 : i32, i32
  }
  func.func @transform_3(%arg0: i32) -> (i32, i32) {
    %c0_i32 = arith.constant 0 : i32
    %c0_i32_0 = arith.constant 0 : i32
    %c0_i32_1 = arith.constant 0 : i32
    return %c0_i32, %c0_i32_0 : i32, i32
  }
  func.func @transform_4(%arg0: i32) -> (i32, i32) {
    %c0_i32 = arith.constant 0 : i32
    %c0_i32_0 = arith.constant 0 : i32
    %c0_i32_1 = arith.constant 0 : i32
    return %c0_i32, %c0_i32_0 : i32, i32
  }
  func.func @transform_5(%arg0: i32) -> (i32, i32) {
    %c0_i32 = arith.constant 0 : i32
    %c0_i32_0 = arith.constant 0 : i32
    %c0_i32_1 = arith.constant 0 : i32
    return %c0_i32, %c0_i32_0 : i32, i32
  }
  func.func @transform_6(%arg0: i32) -> (i32, i32) {
    %c0_i32 = arith.constant 0 : i32
    %c0_i32_0 = arith.constant 0 : i32
    %c0_i32_1 = arith.constant 0 : i32
    return %c0_i32, %c0_i32_0 : i32, i32
  }
  func.func @transform_7(%arg0: i32) -> (i32, i32) {
    %c0_i32 = arith.constant 0 : i32
    %c0_i32_0 = arith.constant 0 : i32
    return %arg0, %c0_i32 : i32, i32
  }
}

</mosaic_0001>

<bundles_post_ra>
// kernel: tpu_custom_call.1
= control target key start
LH: loop header
LB: loop body
LE: loop exit
PB: predicated region body
PF: predicated region fallthrough
CT: control target
= control target key end

     0   :  { %12 = vsyncpa [#allocation5], 0  ;;  %s1339_s0 = inlined_call_operand.hbm [shape: f32[3], index: 0, kind: input, shape index: {}]   ;;  %s1340_s1 = inlined_call_operand.hbm [shape: f32[16,256], index: 1, kind: input, shape index: {}]   ;;  %s1341_s2 = inlined_call_operand.hbm [shape: f32[16,128], index: 2, kind: input, shape index: {}]   ;;  %s1342_s3 = inlined_call_operand.hbm [shape: f32[256,256], index: 3, kind: input, shape index: {}]   ;;  %s1343_s4 = inlined_call_operand.hbm [shape: f32[256,128], index: 4, kind: input, shape index: {}]   ;;  %s1344_s5 = inlined_call_operand.hbm [shape: f32[128,256], index: 5, kind: input, shape index: {}]   ;;  %s1345_s6 = inlined_call_operand.hbm [shape: f32[128,256], index: 6, kind: input, shape index: {}]   ;;  %s1346_s7 = inlined_call_operand.hbm [shape: f32[16,256], index: 7, kind: output, shape index: {}]  }
   0x1   :  { %13 = vsyncpa [#allocation3], 0 }
   0x2   :  { %14 = vsyncpa [#allocation8], 0 }
   0x3   :  { %15 = vsyncpa [#allocation11], 0 }
   0x4   :  { %16 = vsyncpa [#allocation14], 0 }
   0x5   :  { %17 = vsyncpa [#allocation4], 0  ;;  %s1064_s24 = smov [#allocation7]   ;;  %s888_s28 = scalar_lea.hbm %s1341_s2, 256 }
   0x6   :  { %s43_s25 = sshll.u32 %s1064_s24, 4  ;;  %p889_p0 = scmp.ne.s32.totalorder %s1341_s2, %s888_s28  ;;  %s44_s25 = int_to_ptr.vmem [resolvable:$true] %s43_s25 }
   0x7   :  { %p892_p1 = scmp.lt.u32.totalorder %s888_s28, %s1341_s2 }
   0x9   :  { %p894_p2 = pnand %p892_p1, %p889_p0 }
   0xb   :  { %897 = shalt.err (!%p894_p2)
}
   0xc   :  { %s898_s10 = scalar_lea.vmem %s44_s25, 256  ;;  %p903_p4 = scmp.lt.s32.totalorder %s44_s25, %s44_s25 }
   0xd   :  { %p899_p3 = scmp.ne.s32.totalorder %s44_s25, %s898_s10  ;;  %p904_p5 = scmp.lt.s32.totalorder %s898_s10, %s898_s10 }
   0xf   :  { %p905_p6 = por %p904_p5, %p903_p4 }
  0x11   :  { %p906_p7 = pnand %p905_p6, %p899_p3 }
  0x13   :  { %909 = shalt.err (!%p906_p7)
}
  0x14   :  { %s1065_s11 = smov 128   ;;  %s1066_s12 = smov 8  }
  0x15   :  { %49 = dma.hbm_to_vmem [thread:$0]  %s1341_s2, 256, %s44_s25, [#allocation8], %s1065_s11, %s1065_s11, %s1066_s12  }
  0x16   :  { %s1067_s15 = smov [#allocation10]   ;;  %s910_s19 = scalar_lea.hbm %s1343_s4, 4096 }
  0x17   :  { %s67_s16 = sshll.u32 %s1067_s15, 4  ;;  %p911_p8 = scmp.ne.s32.totalorder %s1343_s4, %s910_s19  ;;  %s68_s16 = int_to_ptr.vmem [resolvable:$true] %s67_s16 }
  0x18   :  { %p914_p9 = scmp.lt.u32.totalorder %s910_s19, %s1343_s4 }
  0x1a   :  { %p916_p10 = pnand %p914_p9, %p911_p8 }
  0x1c   :  { %919 = shalt.err (!%p916_p10)
}
  0x1d   :  { %s920_s24 = scalar_lea.vmem %s68_s16, 4096  ;;  %p925_p12 = scmp.lt.s32.totalorder %s68_s16, %s68_s16 }
  0x1e   :  { %p921_p11 = scmp.ne.s32.totalorder %s68_s16, %s920_s24  ;;  %p926_p13 = scmp.lt.s32.totalorder %s920_s24, %s920_s24 }
  0x20   :  { %p927_p0 = por %p926_p13, %p925_p12 }
  0x22   :  { %p928_p1 = pnand %p927_p0, %p921_p11 }
  0x24   :  { %931 = shalt.err (!%p928_p1)
}
  0x25   :  { %73 = dma.hbm_to_vmem [thread:$0]  %s1343_s4, 4096, %s68_s16, [#allocation11], %s1065_s11, %s1065_s11, %s1066_s12  }
  0x26   :  { %s932_s28 = scalar_lea.hbm %s1339_s0, 16 }
  0x27   :  { %p933_p2 = scmp.ne.s32.totalorder %s1339_s0, %s932_s28  ;;  %p936_p3 = scmp.lt.u32.totalorder %s932_s28, %s1339_s0 }
  0x29   :  { %p938_p4 = pnand %p936_p3, %p933_p2 }
  0x2b   :  { %941 = shalt.err (!%p938_p4)
}
  0x2c   :  { %s1068_s10 = smov [#allocation2]   ;;  %s1069_s4 = smov [#allocation6]  }
  0x2d   :  { %25 = dma.hbm_to_smem %s1339_s0, 16, %s1068_s10, [#allocation5]  }
  0x2e   :  { %s31_s11 = sshll.u32 %s1069_s4, 4  ;;  %s942_s16 = scalar_lea.hbm %s1340_s1, 512  ;;  %s32_s11 = int_to_ptr.vmem [resolvable:$true] %s31_s11 }
  0x2f   :  { %p943_p5 = scmp.ne.s32.totalorder %s1340_s1, %s942_s16  ;;  %p946_p6 = scmp.lt.u32.totalorder %s942_s16, %s1340_s1 }
  0x31   :  { %p948_p7 = pnand %p946_p6, %p943_p5 }
  0x33   :  { %951 = shalt.err (!%p948_p7)
}
  0x34   :  { %s952_s21 = scalar_lea.vmem %s32_s11, 512  ;;  %p957_p9 = scmp.lt.s32.totalorder %s32_s11, %s32_s11 }
  0x35   :  { %p953_p8 = scmp.ne.s32.totalorder %s32_s11, %s952_s21  ;;  %p958_p10 = scmp.lt.s32.totalorder %s952_s21, %s952_s21 }
  0x37   :  { %p959_p11 = por %p958_p10, %p957_p9 }
  0x39   :  { %p960_p12 = pnand %p959_p11, %p953_p8 }
  0x3b   :  { %963 = shalt.err (!%p960_p12)
}
  0x3c   :  { %s1070_s0 = smov 256   ;;  %s1071_s22 = smov 16  }
  0x3d   :  { %37 = dma.hbm_to_vmem [thread:$0]  %s1340_s1, 512, %s32_s11, [#allocation3], %s1070_s0, %s1070_s0, %s1071_s22  }
  0x3e   :  { %s1072_s2 = smov [#allocation9]   ;;  %s1073_s26 = smov [#allocation12]  }
  0x3f   :  { %s55_s25 = sshll.u32 %s1072_s2, 4  ;;  %s79_s27 = sshll.u32 %s1073_s26, 4  ;;  %s56_s25 = int_to_ptr.vmem [resolvable:$true] %s55_s25  ;;  %s1168_s27 = int_to_ptr.vmem [resolvable:$true] %s79_s27 }
  0x40   :  { %s964_s30 = scalar_lea.hbm %s1342_s3, 8192 }
  0x41   :  { %p965_p13 = scmp.ne.s32.totalorder %s1342_s3, %s964_s30  ;;  %p968_p0 = scmp.lt.u32.totalorder %s964_s30, %s1342_s3 }
  0x43   :  { %p970_p1 = pnand %p968_p0, %p965_p13 }
  0x45   :  { %973 = shalt.err (!%p970_p1)
}
  0x46   :  { %s974_s1 = scalar_lea.vmem %s56_s25, 8192  ;;  %p979_p3 = scmp.lt.s32.totalorder %s56_s25, %s56_s25 }
  0x47   :  { %p975_p2 = scmp.ne.s32.totalorder %s56_s25, %s974_s1  ;;  %p980_p4 = scmp.lt.s32.totalorder %s974_s1, %s974_s1 }
  0x49   :  { %p981_p5 = por %p980_p4, %p979_p3 }
  0x4b   :  { %p982_p6 = pnand %p981_p5, %p975_p2 }
  0x4d   :  { %985 = shalt.err (!%p982_p6)
}
  0x4e   :  { %61 = dma.hbm_to_vmem [thread:$0]  %s1342_s3, 8192, %s56_s25, [#allocation8], %s1070_s0, %s1070_s0, %s1071_s22  }
  0x4f   :  { %s986_s15 = scalar_lea.hbm %s1344_s5, 4096 }
  0x50   :  { %p987_p7 = scmp.ne.s32.totalorder %s1344_s5, %s986_s15  ;;  %p990_p8 = scmp.lt.u32.totalorder %s986_s15, %s1344_s5 }
  0x52   :  { %p992_p9 = pnand %p990_p8, %p987_p7 }
  0x54   :  { %995 = shalt.err (!%p992_p9)
}
  0x55   :  { %s996_s20 = scalar_lea.vmem %s1168_s27, 4096  ;;  %p1001_p11 = scmp.lt.s32.totalorder %s1168_s27, %s1168_s27 }
  0x56   :  { %p997_p10 = scmp.ne.s32.totalorder %s1168_s27, %s996_s20  ;;  %p1002_p12 = scmp.lt.s32.totalorder %s996_s20, %s996_s20 }
  0x58   :  { %p1003_p13 = por %p1002_p12, %p1001_p11 }
  0x5a   :  { %p1004_p0 = pnand %p1003_p13, %p997_p10 }
  0x5c   :  { %1007 = shalt.err (!%p1004_p0)
}
  0x5d   :  { %85 = dma.hbm_to_vmem [thread:$0]  %s1344_s5, 4096, %s1168_s27, [#allocation11], %s1070_s0, %s1070_s0, %s1071_s22  }
  0x5e   :  { %s1074_s23 = smov [#allocation13]   ;;  %s1008_s26 = scalar_lea.hbm %s1345_s6, 4096 }
  0x5f   :  { %s91_s24 = sshll.u32 %s1074_s23, 4  ;;  %p1009_p1 = scmp.ne.s32.totalorder %s1345_s6, %s1008_s26  ;;  %s92_s24 = int_to_ptr.vmem [resolvable:$true] %s91_s24 }
  0x60   :  { %p1012_p2 = scmp.lt.u32.totalorder %s1008_s26, %s1345_s6 }
  0x62   :  { %p1014_p3 = pnand %p1012_p2, %p1009_p1 }
  0x64   :  { %1017 = shalt.err (!%p1014_p3)
}
  0x65   :  { %s1018_s9 = scalar_lea.vmem %s92_s24, 4096  ;;  %p1023_p5 = scmp.lt.s32.totalorder %s92_s24, %s92_s24 }
  0x66   :  { %p1019_p4 = scmp.ne.s32.totalorder %s92_s24, %s1018_s9  ;;  %p1024_p6 = scmp.lt.s32.totalorder %s1018_s9, %s1018_s9 }
  0x68   :  { %p1025_p7 = por %p1024_p6, %p1023_p5 }
  0x6a   :  { %p1026_p8 = pnand %p1025_p7, %p1019_p4 }
  0x6c   :  { %1029 = shalt.err (!%p1026_p8)
}
  0x6d   :  { %97 = dma.hbm_to_vmem [thread:$0]  %s1345_s6, 4096, %s92_s24, [#allocation14], %s1070_s0, %s1070_s0, %s1071_s22  }
  0x6e   :  { %1052 = dma.done.wait [#allocation5], 16  }
  0x6f   :  { %1053 = vsyncadd [#allocation5], 4294967280 }
  0x70   :  { %1054 = dma.done.wait [#allocation3], 512  }
  0x71   :  { %1055 = vsyncadd [#allocation3], 4294966784 }
  0x72   :  { %1056 = dma.done.wait [#allocation8], 8448  }
  0x73   :  { %1057 = vsyncadd [#allocation8], 4294958848 }
  0x74   :  { %1058 = dma.done.wait [#allocation11], 8192  }
  0x75   :  { %1059 = vsyncadd [#allocation11], 4294959104 }
  0x76   :  { %1060 = dma.done.wait [#allocation14], 4096  }
  0x77   :  { %1061 = vsyncadd [#allocation14], 4294963200 }
  0x78   :  { %119 = sfence }
  0x79   :  { %v128_v0 = vld [vmem:[#allocation9 + $0x8] sm:$0xff]  ;;  %v130_v1 = vld [vmem:[#allocation9 + $0x18] sm:$0xff]  ;;  %v127_v2 = vld [vmem:[#allocation9] sm:$0xff]  ;;  %s120_s6 = sld [smem:[#allocation2]]  ;;  %s659_s10 = sld [smem:[#allocation2 + $0x1]] }
  0x7a   :  { %v699_v3 = vpack.c.bf16 %v130_v1, %v128_v0  ;;  %v129_v4 = vld [vmem:[#allocation9 + $0x10] sm:$0xff]  ;;  %v132_v5 = vld [vmem:[#allocation9 + $0x28] sm:$0xff]  ;;  %v134_v6 = vld [vmem:[#allocation9 + $0x38] sm:$0xff]  ;;  %s660_s13 = sld [smem:[#allocation2 + $0x2]]  ;;  %s1076_s1 = smov [#allocation15]  }
  0x7b   :  { %v701_v7 = vpack.c.bf16 %v129_v4, %v127_v2  ;;  %v703_v8 = vpack.c.bf16 %v134_v6, %v132_v5  ;;  %v131_v9 = vld [vmem:[#allocation9 + $0x20] sm:$0xff]  ;;  %v133_v10 = vld [vmem:[#allocation9 + $0x30] sm:$0xff]  ;;  %v136_v11 = vld [vmem:[#allocation9 + $0x48] sm:$0xff]  ;;  %s643_s14 = sshll.u32 %s1076_s1, 4  ;;  %s644_s14 = int_to_ptr.vmem [resolvable:$true] %s643_s14 }
  0x7c   :  { %700 = vmatprep.subr.bf16.mxu0 %v699_v3  ;;  %v138_v12 = vld [vmem:[#allocation9 + $0x58] sm:$0xff]  ;;  %v705_v13 = vpack.c.bf16 %v133_v10, %v131_v9  ;;  %v135_v15 = vld [vmem:[#allocation9 + $0x40] sm:$0xff]  ;;  %v137_v16 = vld [vmem:[#allocation9 + $0x50] sm:$0xff]  ;;  %s1030_s4 = scalar_lea.vmem %s644_s14, 512  ;;  %p1035_p10 = scmp.lt.s32.totalorder %s644_s14, %s644_s14 }
  0x7d   :  { %702 = vmatpush1.bf16.msra.mxu0 %v701_v7  ;;  %v707_v14 = vpack.c.bf16 %v138_v12, %v136_v11  ;;  %v140_v17 = vld [vmem:[#allocation9 + $0x68] sm:$0xff]  ;;  %v142_v18 = vld [vmem:[#allocation9 + $0x78] sm:$0xff]  ;;  %v709_v19 = vpack.c.bf16 %v137_v16, %v135_v15  ;;  %v139_v21 = vld [vmem:[#allocation9 + $0x60] sm:$0xff]  ;;  %p1031_p9 = scmp.ne.s32.totalorder %s644_s14, %s1030_s4  ;;  %p1036_p11 = scmp.lt.s32.totalorder %s1030_s4, %s1030_s4 }
  0x7e   :  { %704 = vmatprep.subr.bf16.mxu0 %v703_v8  ;;  %v711_v20 = vpack.c.bf16 %v142_v18, %v140_v17  ;;  %v141_v22 = vld [vmem:[#allocation9 + $0x70] sm:$0xff]  ;;  %v144_v23 = vld [vmem:[#allocation9 + $0x88] sm:$0xff]  ;;  %v146_v24 = vld [vmem:[#allocation9 + $0x98] sm:$0xff] }
  0x7f   :  { %v713_v25 = vpack.c.bf16 %v141_v22, %v139_v21  ;;  %v715_v26 = vpack.c.bf16 %v146_v24, %v144_v23  ;;  %v143_v27 = vld [vmem:[#allocation9 + $0x80] sm:$0xff]  ;;  %v145_v28 = vld [vmem:[#allocation9 + $0x90] sm:$0xff]  ;;  %v148_v29 = vld [vmem:[#allocation9 + $0xa8] sm:$0xff]  ;;  %p1037_p12 = por %p1036_p11, %p1035_p10 }
  0x80   :  { %v150_v30 = vld [vmem:[#allocation9 + $0xb8] sm:$0xff]  ;;  %v717_v31 = vpack.c.bf16 %v145_v28, %v143_v27  ;;  %v147_v33 = vld [vmem:[#allocation9 + $0xa0] sm:$0xff]  ;;  %v149_v34 = vld [vmem:[#allocation9 + $0xb0] sm:$0xff] }
  0x81   :  { %706 = vmatpush1.bf16.msra.mxu0 %v705_v13  ;;  %v719_v32 = vpack.c.bf16 %v150_v30, %v148_v29  ;;  %v152_v35 = vld [vmem:[#allocation9 + $0xc8] sm:$0xff]  ;;  %v154_v36 = vld [vmem:[#allocation9 + $0xd8] sm:$0xff]  ;;  %v721_v37 = vpack.c.bf16 %v149_v34, %v147_v33  ;;  %v151_v39 = vld [vmem:[#allocation9 + $0xc0] sm:$0xff]  ;;  %p1038_p13 = pnand %p1037_p12, %p1031_p9 }
  0x82   :  { %708 = vmatprep.subr.bf16.mxu0 %v707_v14  ;;  %v723_v38 = vpack.c.bf16 %v154_v36, %v152_v35  ;;  %v153_v40 = vld [vmem:[#allocation9 + $0xd0] sm:$0xff]  ;;  %v1220_v41 = vld [vmem:[#allocation6 + $0x8] sm:$0xff]  ;;  %v156_v42 = vld [vmem:[#allocation9 + $0xe8] sm:$0xff] }
  0x83   :  { %v158_v43 = vld [vmem:[#allocation9 + $0xf8] sm:$0xff]  ;;  %255 = vmatprep.mubr.f32.mxu0 %v1220_v41  ;;  %v298_v44 = vld [vmem:[#allocation10 + $0x80] sm:$0xff]  ;;  %v157_v46 = vld [vmem:[#allocation9 + $0xf0] sm:$0xff]  ;;  %v725_v50 = vpack.c.bf16 %v153_v40, %v151_v39 }
  0x84   :  { %v155_v45 = vld [vmem:[#allocation9 + $0xe0] sm:$0xff]  ;;  %v299_v47 = vld [vmem:[#allocation10 + $0x88] sm:$0xff]  ;;  %v300_v53 = vld [vmem:[#allocation10 + $0x90] sm:$0xff]  ;;  %v727_v56 = vpack.c.bf16 %v158_v43, %v156_v42 }
  0x85   :  { %710 = vmatpush1.bf16.msra.mxu0 %v709_v19  ;;  %v282_v48 = vld [vmem:[#allocation10] sm:$0xff]  ;;  %v283_v49 = vld [vmem:[#allocation10 + $0x8] sm:$0xff]  ;;  %v763_v51 = vpack.c.bf16 %v299_v47, %v298_v44  ;;  %v301_v54 = vld [vmem:[#allocation10 + $0x98] sm:$0xff]  ;;  %v729_v0 = vpack.c.bf16 %v157_v46, %v155_v45 }
  0x86   :  { %712 = vmatprep.subr.bf16.mxu0 %v711_v20  ;;  %v765_v52 = vpack.c.bf16 %v283_v49, %v282_v48  ;;  %v284_v55 = vld [vmem:[#allocation10 + $0x10] sm:$0xff]  ;;  %v767_v57 = vpack.c.bf16 %v301_v54, %v300_v53  ;;  %v285_v58 = vld [vmem:[#allocation10 + $0x18] sm:$0xff]  ;;  %v302_v59 = vld [vmem:[#allocation10 + $0xa0] sm:$0xff] }
  0x87   :  { %v303_v60 = vld [vmem:[#allocation10 + $0xa8] sm:$0xff]  ;;  %v162_v62 = vld [vmem:[#allocation9 + $0x118] sm:$0xff]  ;;  %764 = vmatprep.subr.bf16.mxu1 %v763_v51  ;;  %v769_v63 = vpack.c.bf16 %v285_v58, %v284_v55  ;;  %v159_v1 = vld [vmem:[#allocation9 + $0x100] sm:$0xff] }
  0x88   :  { %v160_v61 = vld [vmem:[#allocation9 + $0x108] sm:$0xff]  ;;  %766 = vmatpush3.bf16.msra.mxu1 %v765_v52  ;;  %v771_v2 = vpack.c.bf16 %v303_v60, %v302_v59  ;;  %v286_v3 = vld [vmem:[#allocation10 + $0x20] sm:$0xff]  ;;  %v161_v6 = vld [vmem:[#allocation9 + $0x110] sm:$0xff] }
  0x89   :  { %714 = vmatpush1.bf16.msra.mxu0 %v713_v25  ;;  %768 = vmatprep.subr.bf16.mxu1 %v767_v57  ;;  %v287_v4 = vld [vmem:[#allocation10 + $0x28] sm:$0xff]  ;;  %v731_v5 = vpack.c.bf16 %v162_v62, %v160_v61  ;;  %v304_v7 = vld [vmem:[#allocation10 + $0xb0] sm:$0xff]  ;;  %v305_v8 = vld [vmem:[#allocation10 + $0xb8] sm:$0xff]  ;;  %v733_v12 = vpack.c.bf16 %v161_v6, %v159_v1 }
  0x8a   :  { %716 = vmatprep.subr.bf16.mxu0 %v715_v26  ;;  %v164_v9 = vld [vmem:[#allocation9 + $0x128] sm:$0xff]  ;;  %v166_v10 = vld [vmem:[#allocation9 + $0x138] sm:$0xff]  ;;  %v773_v11 = vpack.c.bf16 %v287_v4, %v286_v3  ;;  %v163_v13 = vld [vmem:[#allocation9 + $0x120] sm:$0xff]  ;;  %v775_v14 = vpack.c.bf16 %v305_v8, %v304_v7 }
  0x8b   :  { %v288_v15 = vld [vmem:[#allocation10 + $0x30] sm:$0xff]  ;;  %v289_v16 = vld [vmem:[#allocation10 + $0x38] sm:$0xff]  ;;  %v735_v17 = vpack.c.bf16 %v166_v10, %v164_v9  ;;  %v306_v19 = vld [vmem:[#allocation10 + $0xc0] sm:$0xff] }
  0x8c   :  { %770 = vmatpush3.bf16.msra.mxu1 %v769_v63  ;;  %v165_v18 = vld [vmem:[#allocation9 + $0x130] sm:$0xff]  ;;  %v307_v20 = vld [vmem:[#allocation10 + $0xc8] sm:$0xff]  ;;  %v170_v22 = vld [vmem:[#allocation9 + $0x158] sm:$0xff]  ;;  %v777_v23 = vpack.c.bf16 %v289_v16, %v288_v15 }
  0x8d   :  { %718 = vmatpush1.bf16.msra.mxu0 %v717_v31  ;;  %772 = vmatprep.subr.bf16.mxu1 %v771_v2  ;;  %v168_v21 = vld [vmem:[#allocation9 + $0x148] sm:$0xff]  ;;  %v737_v24 = vpack.c.bf16 %v165_v18, %v163_v13  ;;  %v167_v25 = vld [vmem:[#allocation9 + $0x140] sm:$0xff]  ;;  %v779_v26 = vpack.c.bf16 %v307_v20, %v306_v19  ;;  %v169_v30 = vld [vmem:[#allocation9 + $0x150] sm:$0xff] }
  0x8e   :  { %720 = vmatprep.subr.bf16.mxu0 %v719_v32  ;;  %v290_v27 = vld [vmem:[#allocation10 + $0x40] sm:$0xff]  ;;  %v291_v28 = vld [vmem:[#allocation10 + $0x48] sm:$0xff]  ;;  %v739_v29 = vpack.c.bf16 %v170_v22, %v168_v21  ;;  %v308_v31 = vld [vmem:[#allocation10 + $0xd0] sm:$0xff]  ;;  %v741_v36 = vpack.c.bf16 %v169_v30, %v167_v25 }
  0x8f   :  { %v309_v32 = vld [vmem:[#allocation10 + $0xd8] sm:$0xff]  ;;  %v172_v33 = vld [vmem:[#allocation9 + $0x168] sm:$0xff]  ;;  %v781_v35 = vpack.c.bf16 %v291_v28, %v290_v27  ;;  %v171_v42 = vld [vmem:[#allocation9 + $0x160] sm:$0xff] }
  0x90   :  { %774 = vmatpush3.bf16.msra.mxu1 %v773_v11  ;;  %v174_v34 = vld [vmem:[#allocation9 + $0x178] sm:$0xff]  ;;  %v173_v43 = vld [vmem:[#allocation9 + $0x170] sm:$0xff]  ;;  %v176_v44 = vld [vmem:[#allocation9 + $0x188] sm:$0xff] }
  0x91   :  { %722 = vmatpush1.bf16.msra.mxu0 %v721_v37  ;;  %776 = vmatprep.subr.bf16.mxu1 %v775_v14  ;;  %v783_v37 = vpack.c.bf16 %v309_v32, %v308_v31  ;;  %v293_v39 = vld [vmem:[#allocation10 + $0x58] sm:$0xff]  ;;  %v743_v40 = vpack.c.bf16 %v174_v34, %v172_v33  ;;  %v745_v47 = vpack.c.bf16 %v173_v43, %v171_v42  ;;  %v175_v49 = vld [vmem:[#allocation9 + $0x180] sm:$0xff]  ;;  %v180_v51 = vld [vmem:[#allocation9 + $0x1a8] sm:$0xff] }
  0x92   :  { %724 = vmatprep.subr.bf16.mxu0 %v723_v38  ;;  %v292_v38 = vld [vmem:[#allocation10 + $0x50] sm:$0xff]  ;;  %v178_v45 = vld [vmem:[#allocation9 + $0x198] sm:$0xff]  ;;  %v179_v55 = vld [vmem:[#allocation9 + $0x1a0] sm:$0xff] }
  0x93   :  { %v785_v46 = vpack.c.bf16 %v293_v39, %v292_v38  ;;  %v747_v48 = vpack.c.bf16 %v178_v45, %v176_v44  ;;  %v182_v52 = vld [vmem:[#allocation9 + $0x1b8] sm:$0xff]  ;;  %v184_v57 = vld [vmem:[#allocation9 + $0x1c8] sm:$0xff]  ;;  %v183_v61 = vld [vmem:[#allocation9 + $0x1c0] sm:$0xff] }
  0x94   :  { %778 = vmatpush3.bf16.msra.mxu1 %v777_v23  ;;  %v751_v54 = vpack.c.bf16 %v182_v52, %v180_v51  ;;  %v186_v58 = vld [vmem:[#allocation9 + $0x1d8] sm:$0xff]  ;;  %v185_v62 = vld [vmem:[#allocation9 + $0x1d0] sm:$0xff]  ;;  %v188_v63 = vld [vmem:[#allocation9 + $0x1e8] sm:$0xff] }
  0x95   :  { %726 = vmatpush1.bf16.msra.mxu0 %v725_v50  ;;  %780 = vmatprep.subr.bf16.mxu1 %v779_v26  ;;  %v177_v50 = vld [vmem:[#allocation9 + $0x190] sm:$0xff]  ;;  %v755_v60 = vpack.c.bf16 %v186_v58, %v184_v57  ;;  %v757_v1 = vpack.c.bf16 %v185_v62, %v183_v61  ;;  %v187_v3 = vld [vmem:[#allocation9 + $0x1e0] sm:$0xff]  ;;  %v1225_v7 = vld [vmem:[#allocation6 + $0x18] sm:$0xff]  ;;  %v1268_v61 = vstv %s120_s6 }
  0x96   :  { %728 = vmatprep.subr.bf16.mxu0 %v727_v56  ;;  %v749_v53 = vpack.c.bf16 %v177_v50, %v175_v49  ;;  %v181_v56 = vld [vmem:[#allocation9 + $0x1b0] sm:$0xff]  ;;  %v1229_v8 = vld [vmem:[#allocation6 + $0x10] sm:$0xff]  ;;  %v311_v10 = vld [vmem:[#allocation10 + $0xe8] sm:$0xff] }
  0x97   :  { %v753_v59 = vpack.c.bf16 %v181_v56, %v179_v55  ;;  %v189_v4 = vld [vmem:[#allocation9 + $0x1f0] sm:$0xff]  ;;  %v310_v9 = vld [vmem:[#allocation10 + $0xe0] sm:$0xff]  ;;  %v295_v13 = vld [vmem:[#allocation10 + $0x68] sm:$0xff] }
  0x98   :  { %782 = vmatpush3.bf16.msra.mxu1 %v781_v35  ;;  %v1223_v6 = vld [vmem:[#allocation6] sm:$0xff]  ;;  %v787_v11 = vpack.c.bf16 %v311_v10, %v310_v9  ;;  %v313_v16 = vld [vmem:[#allocation10 + $0xf8] sm:$0xff]  ;;  %v397_v21 = vld [vmem:[#allocation12 + $0x8] sm:$0xff] }
  0x99   :  { %730 = vmatpush1.bf16.msra.mxu0 %v729_v0  ;;  %784 = vmatprep.subr.bf16.mxu1 %v783_v37  ;;  %v190_v0 = vld [vmem:[#allocation9 + $0x1f8] sm:$0xff]  ;;  %v312_v15 = vld [vmem:[#allocation10 + $0xf0] sm:$0xff]  ;;  %v505_v27 = vld [vmem:[#allocation13] sm:$0xff] }
  0x9a   :  { %732 = vmatprep.subr.bf16.mxu0 %v731_v5  ;;  %v759_v2 = vpack.c.bf16 %v190_v0, %v188_v63  ;;  %v761_v5 = vpack.c.bf16 %v189_v4, %v187_v3  ;;  %v296_v18 = vld [vmem:[#allocation10 + $0x70] sm:$0xff]  ;;  %v297_v19 = vld [vmem:[#allocation10 + $0x78] sm:$0xff]  ;;  %v510_v30 = vld [vmem:[#allocation13 + $0x28] sm:$0xff]  ;;  %v1279_v3 = vstv %s659_s10 }
  0x9b   :  { %v793_v20 = vpack.c.bf16 %v297_v19, %v296_v18  ;;  %v399_v22 = vld [vmem:[#allocation12 + $0x18] sm:$0xff]  ;;  %v507_v28 = vld [vmem:[#allocation13 + $0x10] sm:$0xff]  ;;  %v509_v32 = vld [vmem:[#allocation13 + $0x20] sm:$0xff] }
  0x9c   :  { %786 = vmatpush3.bf16.msra.mxu1 %v785_v46  ;;  %v795_v23 = vpack.c.bf16 %v399_v22, %v397_v21  ;;  %v508_v25 = vld [vmem:[#allocation13 + $0x18] sm:$0xff]  ;;  %v511_v34 = vld [vmem:[#allocation13 + $0x30] sm:$0xff]  ;;  %v513_v38 = vld [vmem:[#allocation13 + $0x40] sm:$0xff] }
  0x9d   :  { %734 = vmatpush1.bf16.msra.mxu0 %v733_v12  ;;  %v294_v12 = vld [vmem:[#allocation10 + $0x60] sm:$0xff]  ;;  %788 = vmatprep.subr.bf16.mxu1 %v787_v11  ;;  %v512_v31 = vld [vmem:[#allocation13 + $0x38] sm:$0xff]  ;;  %v1240_v35 = vpack.c.bf16 %v511_v34, %v509_v32  ;;  %v515_v39 = vld [vmem:[#allocation13 + $0x50] sm:$0xff] }
  0x9e   :  { %736 = vmatprep.subr.bf16.mxu0 %v735_v17  ;;  %v789_v14 = vpack.c.bf16 %v295_v13, %v294_v12  ;;  %v791_v17 = vpack.c.bf16 %v313_v16, %v312_v15  ;;  %v1238_v33 = vpack.c.bf16 %v512_v31, %v510_v30  ;;  %v516_v37 = vld [vmem:[#allocation13 + $0x58] sm:$0xff]  ;;  %v1246_v42 = vpack.c.bf16 %v515_v39, %v513_v38  ;;  %v518_v43 = vld [vmem:[#allocation13 + $0x68] sm:$0xff]  ;;  %v517_v46 = vld [vmem:[#allocation13 + $0x60] sm:$0xff] }
  0x9f   :  { %v520_v44 = vld [vmem:[#allocation13 + $0x78] sm:$0xff]  ;;  %v522_v49 = vld [vmem:[#allocation13 + $0x88] sm:$0xff]  ;;  %v521_v52 = vld [vmem:[#allocation13 + $0x80] sm:$0xff] }
  0xa0   :  { %790 = vmatpush3.bf16.msra.mxu1 %v789_v14  ;;  %v1249_v45 = vpack.c.bf16 %v520_v44, %v518_v43  ;;  %v524_v50 = vld [vmem:[#allocation13 + $0x98] sm:$0xff]  ;;  %v526_v55 = vld [vmem:[#allocation13 + $0xa8] sm:$0xff]  ;;  %v525_v58 = vld [vmem:[#allocation13 + $0xa0] sm:$0xff] }
  0xa1   :  { %738 = vmatpush1.bf16.msra.mxu0 %v737_v24  ;;  %792 = vmatprep.subr.bf16.mxu1 %v791_v17  ;;  %v506_v24 = vld [vmem:[#allocation13 + $0x8] sm:$0xff]  ;;  %v1255_v51 = vpack.c.bf16 %v524_v50, %v522_v49  ;;  %v528_v56 = vld [vmem:[#allocation13 + $0xb8] sm:$0xff]  ;;  %v396_v4 = vld [vmem:[#allocation12] sm:$0xff] }
  0xa2   :  { %740 = vmatprep.subr.bf16.mxu0 %v739_v29  ;;  %v1232_v26 = vpack.c.bf16 %v508_v25, %v506_v24  ;;  %v1234_v29 = vpack.c.bf16 %v507_v28, %v505_v27  ;;  %v1261_v57 = vpack.c.bf16 %v528_v56, %v526_v55  ;;  %v401_v11 = vld [vmem:[#allocation12 + $0x28] sm:$0xff]  ;;  %v403_v12 = vld [vmem:[#allocation12 + $0x38] sm:$0xff]  ;;  %v400_v19 = vld [vmem:[#allocation12 + $0x20] sm:$0xff] }
  0xa3   :  { %v405_v22 = vld [vmem:[#allocation12 + $0x48] sm:$0xff]  ;;  %v404_v30 = vld [vmem:[#allocation12 + $0x40] sm:$0xff]  ;;  %v406_v31 = vld [vmem:[#allocation12 + $0x50] sm:$0xff] }
  0xa4   :  { %794 = vmatpush3.bf16.msra.mxu1 %v793_v20  ;;  %v402_v20 = vld [vmem:[#allocation12 + $0x30] sm:$0xff]  ;;  %v411_v32 = vld [vmem:[#allocation12 + $0x78] sm:$0xff]  ;;  %v805_v34 = vpack.c.bf16 %v406_v31, %v404_v30  ;;  %v413_v38 = vld [vmem:[#allocation12 + $0x88] sm:$0xff] }
  0xa5   :  { %742 = vmatpush1.bf16.msra.mxu0 %v741_v36  ;;  %796 = vmatprep.subr.bf16.mxu1 %v795_v23  ;;  %v514_v36 = vld [vmem:[#allocation13 + $0x48] sm:$0xff]  ;;  %v407_v23 = vld [vmem:[#allocation12 + $0x58] sm:$0xff]  ;;  %v801_v27 = vpack.c.bf16 %v402_v20, %v400_v19  ;;  %v416_v55 = vld [vmem:[#allocation12 + $0xa0] sm:$0xff] }
  0xa6   :  { %744 = vmatprep.subr.bf16.mxu0 %v743_v40  ;;  %v1243_v40 = vpack.c.bf16 %v516_v37, %v514_v36  ;;  %v803_v28 = vpack.c.bf16 %v407_v23, %v405_v22  ;;  %v408_v36 = vld [vmem:[#allocation12 + $0x60] sm:$0xff]  ;;  %v410_v37 = vld [vmem:[#allocation12 + $0x70] sm:$0xff]  ;;  %v415_v39 = vld [vmem:[#allocation12 + $0x98] sm:$0xff] }
  0xa7   :  { %v809_v43 = vpack.c.bf16 %v410_v37, %v408_v36  ;;  %v811_v44 = vpack.c.bf16 %v415_v39, %v413_v38  ;;  %v417_v49 = vld [vmem:[#allocation12 + $0xa8] sm:$0xff]  ;;  %v419_v50 = vld [vmem:[#allocation12 + $0xb8] sm:$0xff]  ;;  %v418_v56 = vld [vmem:[#allocation12 + $0xb0] sm:$0xff] }
  0xa8   :  { %v426_v19 = vld [vmem:[#allocation12 + $0xf0] sm:$0xff]  ;;  %v534_v20 = vld [vmem:[#allocation13 + $0xe8] sm:$0xff]  ;;  %v536_v22 = vld [vmem:[#allocation13 + $0xf8] sm:$0xff] }
  0xa9   :  { %746 = vmatpush1.bf16.msra.mxu0 %v745_v47  ;;  %v519_v47 = vld [vmem:[#allocation13 + $0x70] sm:$0xff]  ;;  %v533_v23 = vld [vmem:[#allocation13 + $0xe0] sm:$0xff]  ;;  %v390_v38 = vld [vmem:[#allocation7 + $0x8] sm:$0xff] }
  0xaa   :  { %748 = vmatprep.subr.bf16.mxu0 %v747_v48  ;;  %v1252_v48 = vpack.c.bf16 %v519_v47, %v517_v46  ;;  %v412_v46 = vld [vmem:[#allocation12 + $0x80] sm:$0xff]  ;;  %v414_v47 = vld [vmem:[#allocation12 + $0x90] sm:$0xff] }
  0xad   :  { %750 = vmatpush1.bf16.msra.mxu0 %v749_v53  ;;  %v523_v53 = vld [vmem:[#allocation13 + $0x90] sm:$0xff] }
  0xae   :  { %752 = vmatprep.subr.bf16.mxu0 %v751_v54  ;;  %v1258_v54 = vpack.c.bf16 %v523_v53, %v521_v52  ;;  %v813_v52 = vpack.c.bf16 %v414_v47, %v412_v46  ;;  %v815_v53 = vpack.c.bf16 %v419_v50, %v417_v49 }
  0xb1   :  { %754 = vmatpush1.bf16.msra.mxu0 %v753_v59  ;;  %v527_v59 = vld [vmem:[#allocation13 + $0xb0] sm:$0xff] }
  0xb2   :  { %756 = vmatprep.subr.bf16.mxu0 %v755_v60  ;;  %v1264_v60 = vpack.c.bf16 %v527_v59, %v525_v58  ;;  %v421_v58 = vld [vmem:[#allocation12 + $0xc8] sm:$0xff]  ;;  %v423_v59 = vld [vmem:[#allocation12 + $0xd8] sm:$0xff] }
  0xb5   :  { %758 = vmatpush1.bf16.msra.mxu0 %v757_v1 }
  0xb6   :  { %760 = vmatprep.subr.bf16.mxu0 %v759_v2 }
  0xb9   :  { %762 = vmatpush1.bf16.msra.mxu0 %v761_v5  ;;  %v398_v5 = vld [vmem:[#allocation12 + $0x10] sm:$0xff] }
  0xba   :  { %828 = vmatprep.subr.bf16.mxu0 %v1232_v26  ;;  %v797_v16 = vpack.c.bf16 %v398_v5, %v396_v4  ;;  %v422_v4 = vld [vmem:[#allocation12 + $0xd0] sm:$0xff]  ;;  %v530_v5 = vld [vmem:[#allocation13 + $0xc8] sm:$0xff] }
  0xbc   :  { %256 = vmatmul.mubr.f32.vlgmr.msra.gmra.mrb[0].mxu0 %v1223_v6 }
  0xbd   :  { %261 = vmatprep.mubr.f32.mxu0 %v1225_v7  ;;  %830 = vmatpush1.bf16.msra.mxu0 %v1234_v29 }
  0xbe   :  { %832 = vmatprep.subr.bf16.mxu0 %v1238_v33 }
  0xc0   :  { %262 = vmatmul.mubr.f32.gmra.mrb[2].mxu0 %v1229_v8 }
  0xc1   :  { %834 = vmatpush1.bf16.msra.mxu0 %v1240_v35 }
  0xc2   :  { %836 = vmatprep.subr.bf16.mxu0 %v1243_v40 }
  0xc5   :  { %838 = vmatpush1.bf16.msra.mxu0 %v1246_v42 }
  0xc6   :  { %840 = vmatprep.subr.bf16.mxu0 %v1249_v45 }
  0xc9   :  { %842 = vmatpush1.bf16.msra.mxu0 %v1252_v48 }
  0xca   :  { %844 = vmatprep.subr.bf16.mxu0 %v1255_v51 }
  0xcd   :  { %846 = vmatpush1.bf16.msra.mxu0 %v1258_v54 }
  0xce   :  { %848 = vmatprep.subr.bf16.mxu0 %v1261_v57 }
  0xd1   :  { %850 = vmatpush1.bf16.msra.mxu0 %v1264_v60 }
 0x18f   :  { %v1270_v62 = vpop.f32.mrb[0].mxu0 }
 0x190   :  { %v269_v63 = vmul.f32 %v1268_v61, %v1270_v62  ;;  %v1274_v0 = vpop.f32.mrb[1].mxu0 }
 0x191   :  { %v270_v1 = vmul.f32 %v1268_v61, %v1274_v0 }
 0x192   :  { %v273_v2 = vsub.f32 %v1223_v6, %v269_v63  ;;  %v817_v63 = vpack.c.bf16 %v418_v56, %v416_v55 }
 0x193   :  { %v274_v9 = vsub.f32 %v1220_v41, %v270_v1  ;;  %v1282_v10 = vpop.f32.mrb[2].mxu0  ;;  %v799_v41 = vpack.c.bf16 %v403_v12, %v401_v11  ;;  %v819_v1 = vpack.c.bf16 %v423_v59, %v421_v58  ;;  %v532_v11 = vld [vmem:[#allocation13 + $0xd8] sm:$0xff]  ;;  %v529_v12 = vld [vmem:[#allocation13 + $0xc0] sm:$0xff] }
 0x194   :  { %v271_v13 = vmul.f32 %v1268_v61, %v1282_v10  ;;  %v1286_v14 = vpop.f32.mrb[3].mxu0  ;;  %v278_v17 = vmul.f32 %v1279_v3, %v273_v2  ;;  %v420_v2 = vld [vmem:[#allocation12 + $0xc0] sm:$0xff] }
 0x195   :  { %v279_v15 = vmul.f32 %v1279_v3, %v274_v9  ;;  %v272_v6 = vmul.f32 %v1268_v61, %v1286_v14  ;;  %v821_v9 = vpack.c.bf16 %v422_v4, %v420_v2 }
 0x196   :  { %v275_v18 = vsub.f32 %v1229_v8, %v271_v13  ;;  %v409_v8 = vld [vmem:[#allocation12 + $0x68] sm:$0xff]  ;;  %v531_v13 = vld [vmem:[#allocation13 + $0xd0] sm:$0xff] }
 0x197   :  { %378 = vmatprep.mubr.f32.mxu1 %v279_v15  ;;  %v276_v21 = vsub.f32 %v1225_v7, %v272_v6  ;;  %v807_v7 = vpack.c.bf16 %v411_v32, %v409_v8  ;;  %v851_v15 = vpack.c.bf16 %v532_v11, %v530_v5  ;;  %v853_v6 = vpack.c.bf16 %v531_v13, %v529_v12  ;;  %v389_v8 = vld [vmem:[#allocation7] sm:$0xff] }
 0x198   :  { %379 = vmatmul.mubr.f32.vlgmr.msra.gmra.mrb[0].mxu1 %v278_v17  ;;  %v280_v24 = vmul.f32 %v1279_v3, %v275_v18  ;;  %v427_v17 = vld [vmem:[#allocation12 + $0xf8] sm:$0xff] }
 0x199   :  { %v281_v25 = vmul.f32 %v1279_v3, %v276_v21  ;;  %798 = vmatpush1.bf16.msra.mxu1 %v797_v16  ;;  %v425_v16 = vld [vmem:[#allocation12 + $0xe8] sm:$0xff]  ;;  %852 = vmatprep.subr.bf16.mxu0 %v851_v15 }
 0x19a   :  { %800 = vmatprep.subr.bf16.mxu1 %v799_v41  ;;  %v823_v18 = vpack.c.bf16 %v427_v17, %v425_v16  ;;  %v424_v41 = vld [vmem:[#allocation12 + $0xe0] sm:$0xff]  ;;  %854 = vmatpush1.bf16.msra.mxu0 %v853_v6 }
 0x19b   :  { %383 = vmatprep.mubr.f32.mxu1 %v281_v25  ;;  %v825_v21 = vpack.c.bf16 %v426_v19, %v424_v41  ;;  %v535_v25 = vld [vmem:[#allocation13 + $0xf0] sm:$0xff] }
 0x19c   :  { %384 = vmatmul.mubr.f32.gmra.mrb[2].mxu1 %v280_v24  ;;  %v855_v24 = vpack.c.bf16 %v536_v22, %v534_v20 }
 0x19d   :  { %802 = vmatpush1.bf16.msra.mxu1 %v801_v27  ;;  %v857_v27 = vpack.c.bf16 %v535_v25, %v533_v23 }
 0x19e   :  { %804 = vmatprep.subr.bf16.mxu1 %v803_v28  ;;  %856 = vmatprep.subr.bf16.mxu0 %v855_v24  ;;  %v1075_v28 = vmov 0.0  }
 0x19f   :  { %858 = vmatpush1.bf16.msra.mxu0 %v857_v27  ;;  %492 = vmatprep.mubr.f32.mxu1 %v1075_v28 }
 0x1a0   :  { %601 = vmatprep.mubr.f32.mxu0 %v1075_v28 }
 0x1a1   :  { %806 = vmatpush1.bf16.msra.mxu1 %v805_v34  ;;  %v393_v34 = vstv %s660_s13 }
 0x1a2   :  { %808 = vmatprep.subr.bf16.mxu1 %v807_v7 }
 0x1a5   :  { %810 = vmatpush1.bf16.msra.mxu1 %v809_v43 }
 0x1a6   :  { %812 = vmatprep.subr.bf16.mxu1 %v811_v44 }
 0x1a9   :  { %814 = vmatpush1.bf16.msra.mxu1 %v813_v52 }
 0x1aa   :  { %816 = vmatprep.subr.bf16.mxu1 %v815_v53 }
 0x1ad   :  { %818 = vmatpush1.bf16.msra.mxu1 %v817_v63 }
 0x1ae   :  { %820 = vmatprep.subr.bf16.mxu1 %v819_v1 }
 0x1b1   :  { %822 = vmatpush1.bf16.msra.mxu1 %v821_v9 }
 0x1b2   :  { %824 = vmatprep.subr.bf16.mxu1 %v823_v18 }
 0x1b5   :  { %826 = vmatpush1.bf16.msra.mxu1 %v825_v21 }
 0x1b6   :  { %859 = vmatprep.subr.bf16.mxu1 %v1232_v26 }
 0x26b   :  { %v693_v30 = vpop.f32.mrb[0].mxu1 }
 0x26c   :  { %v694_v31 = vpop.f32.mrb[1].mxu1 }
 0x26d   :  { %v695_v32 = vadd.f32 %v694_v31, %v693_v30 }
 0x26f   :  { %v391_v7 = vsub.f32 %v389_v8, %v695_v32  ;;  %v696_v36 = vpop.f32.mrb[2].mxu1 }
 0x270   :  { %v697_v37 = vpop.f32.mrb[3].mxu1 }
 0x271   :  { %v394_v39 = vmul.f32 %v393_v34, %v391_v7  ;;  %v698_v43 = vadd.f32 %v697_v37, %v696_v36 }
 0x273   :  { %493 = vmatmul.mubr.f32.vlgmr.msra.gmra.mrb[4].mxu1 %v394_v39  ;;  %602 = vmatmul.mubr.f32.vlgmr.msra.gmra.mrb[4].mxu0 %v394_v39  ;;  %v392_v44 = vsub.f32 %v390_v38, %v698_v43 }
 0x274   :  { %867 = vmatpush1.bf16.msra.mxu1 %v1234_v29  ;;  %498 = vmatprep.mubr.f32.mxu1 %v1075_v28 }
 0x275   :  { %860 = vmatprep.subr.bf16.mxu1 %v1238_v33  ;;  %v395_v26 = vmul.f32 %v393_v34, %v392_v44 }
 0x277   :  { %499 = vmatmul.mubr.f32.gmra.mrb[6].mxu1 %v395_v26 }
 0x278   :  { %868 = vmatpush1.bf16.msra.mxu1 %v1240_v35  ;;  %607 = vmatprep.mubr.f32.mxu1 %v1075_v28 }
 0x279   :  { %861 = vmatprep.subr.bf16.mxu1 %v1243_v40 }
 0x27c   :  { %869 = vmatpush1.bf16.msra.mxu1 %v1246_v42 }
 0x27d   :  { %862 = vmatprep.subr.bf16.mxu1 %v1249_v45 }
 0x280   :  { %870 = vmatpush1.bf16.msra.mxu1 %v1252_v48 }
 0x281   :  { %863 = vmatprep.subr.bf16.mxu1 %v1255_v51 }
 0x284   :  { %871 = vmatpush1.bf16.msra.mxu1 %v1258_v54 }
 0x285   :  { %864 = vmatprep.subr.bf16.mxu1 %v1261_v57 }
 0x288   :  { %872 = vmatpush1.bf16.msra.mxu1 %v1264_v60 }
 0x289   :  { %865 = vmatprep.subr.bf16.mxu1 %v851_v15 }
 0x28c   :  { %873 = vmatpush1.bf16.msra.mxu1 %v853_v6 }
 0x28d   :  { %866 = vmatprep.subr.bf16.mxu1 %v855_v24 }
 0x290   :  { %874 = vmatpush1.bf16.msra.mxu1 %v857_v27 }
 0x293   :  { %608 = vmatmul.mubr.f32.vlgmr.msra.gmra.mrb[8].mxu1 %v395_v26 }
 0x346   :  { %v494_v29 = vpop.f32.mrb[4].mxu1  ;;  %v603_v33 = vpop.f32.mrb[4].mxu0 }
 0x347   :  { %v614_v35 = vmul.f32 %v603_v33, %v1268_v61  ;;  %v496_v40 = vpop.f32.mrb[5].mxu1  ;;  %v605_v42 = vpop.f32.mrb[5].mxu0 }
 0x348   :  { %v615_v45 = vmul.f32 %v605_v42, %v1268_v61 }
 0x349   :  { %v618_v48 = vsub.f32 %v494_v29, %v614_v35 }
 0x34a   :  { %v619_v51 = vsub.f32 %v496_v40, %v615_v45  ;;  %v500_v54 = vpop.f32.mrb[6].mxu1 }
 0x34b   :  { %v622_v57 = vmul.f32 %v618_v48, %v1279_v3  ;;  %v502_v46 = vpop.f32.mrb[7].mxu1 }
 0x34c   :  { %v623_v60 = vmul.f32 %v619_v51, %v1279_v3 }
 0x34d   :  { %v626_v47 = vmul.f32 %v622_v57, %v1268_v61 }
 0x34e   :  { %v627_v49 = vmul.f32 %v623_v60, %v1268_v61 }
 0x34f   :  { %v630_v50 = vsub.f32 %v1270_v62, %v626_v47 }
 0x350   :  { %v631_v52 = vsub.f32 %v1274_v0, %v627_v49 }
 0x351   :  { %634 = vst [vmem:[#allocation15] sm:$0xff] %v630_v50 }
 0x352   :  { %635 = vst [vmem:[#allocation15 + $0x8] sm:$0xff] %v631_v52 }
 0x366   :  { %v609_v53 = vpop.f32.mrb[8].mxu1 }
 0x367   :  { %v616_v55 = vmul.f32 %v609_v53, %v1268_v61  ;;  %v611_v56 = vpop.f32.mrb[9].mxu1 }
 0x368   :  { %v617_v58 = vmul.f32 %v611_v56, %v1268_v61 }
 0x369   :  { %v620_v59 = vsub.f32 %v500_v54, %v616_v55 }
 0x36a   :  { %v621_v63 = vsub.f32 %v502_v46, %v617_v58 }
 0x36b   :  { %v624_v1 = vmul.f32 %v620_v59, %v1279_v3 }
 0x36c   :  { %v625_v2 = vmul.f32 %v621_v63, %v1279_v3 }
 0x36d   :  { %v628_v4 = vmul.f32 %v624_v1, %v1268_v61 }
 0x36e   :  { %v629_v62 = vmul.f32 %v625_v2, %v1268_v61 }
 0x36f   :  { %v632_v0 = vsub.f32 %v1282_v10, %v628_v4 }
 0x370   :  { %v633_v5 = vsub.f32 %v1286_v14, %v629_v62 }
 0x371   :  { %636 = vst [vmem:[#allocation15 + $0x10] sm:$0xff] %v632_v0 }
 0x372   :  { %637 = vst [vmem:[#allocation15 + $0x18] sm:$0xff] %v633_v5 }
 0x373   :  { %1041 = shalt.err (!%p1038_p13)
}
 0x374   :  { %s1042_s15 = scalar_lea.hbm %s1346_s7, 512 }
 0x375   :  { %p1043_p0 = scmp.ne.s32.totalorder %s1346_s7, %s1042_s15  ;;  %p1046_p1 = scmp.lt.u32.totalorder %s1042_s15, %s1346_s7 }
 0x377   :  { %p1048_p2 = pnand %p1046_p1, %p1043_p0 }
 0x379   :  { %1051 = shalt.err (!%p1048_p2)
}
 0x37a   :  { %649 = dma.vmem_to_hbm [thread:$0]  %s644_s14, 512, %s1346_s7, [#allocation4], %s1070_s0, %s1070_s0, %s1071_s22  }
 0x37b   :  { %1062 = dma.done.wait [#allocation4], 512  }
 0x37c   :  { %1063 = vsyncadd [#allocation4], 4294966784 }
 0x37d   :  { %653 = vsyncpa [#allocation3], 1 }
 0x37e   :  { %654 = vsyncpa [#allocation8], 1 }
 0x37f   :  { %655 = vsyncpa [#allocation11], 1 }
 0x380   :  { %656 = vsyncpa [#allocation14], 1 }
 0x381   :  { %657 = vsyncpa [#allocation4], 1 }
 0x382   :  { %658 = vsyncpa [#allocation5], 1 }

</bundles_post_ra>
